<compile_context>
chip_gen: v7x
topology: tpu7x:2x2x1
jax: 0.10.0
libtpu: 0.0.40
codegen_flags: <defaults>
</compile_context>

<pallas_src>
import jax
import jax.numpy as jnp
from jax.experimental import pallas as pl
from jax.experimental.pallas import tpu as pltpu


def _round_up(x, m):
    return ((x + m - 1) // m) * m


# ----------------------------- feature extractor -----------------------------

def fe_kernel(x_ref, w_ref, b_ref, o_ref):
    # x_ref: (tb, C, H*W), w_ref: (C, 2048), b_ref: (1, 2048), o_ref: (tb, 2048)
    x = x_ref[...].astype(jnp.float32)
    pooled = jnp.mean(x, axis=-1)                                # (tb, C) global avg pool
    feats = jnp.dot(pooled, w_ref[...],
                    preferred_element_type=jnp.float32) + b_ref[...]
    o_ref[...] = jnp.maximum(feats, 0.0)                         # ResNet features are post-ReLU


def feature_extractor(x_nchw, w_fe, b_fe):
    B, C, H, W = x_nchw.shape
    HW = H * W
    F_out = w_fe.shape[1]
    x3 = x_nchw.reshape(B, C, HW)

    tb = B if B <= 8 else 8                      # tile batch; tiny B -> one step
    Bp = _round_up(B, tb)
    if Bp != B:
        x3 = jnp.pad(x3, ((0, Bp - B), (0, 0), (0, 0)))

    out = pl.pallas_call(
        fe_kernel,
        grid=(Bp // tb,),
        in_specs=[
            pl.BlockSpec((tb, C, HW), lambda i: (i, 0, 0)),
            pl.BlockSpec((C, F_out), lambda i: (0, 0)),
            pl.BlockSpec((1, F_out), lambda i: (0, 0)),
        ],
        out_specs=pl.BlockSpec((tb, F_out), lambda i: (i, 0)),
        out_shape=jax.ShapeDtypeStruct((Bp, F_out), jnp.float32),
        compiler_params=pltpu.CompilerParams(
            dimension_semantics=("parallel",)),
    )(x3, w_fe, b_fe)
    return out[:B]


# ------------------------------ MC-dropout head -------------------------------

def mc_head_kernel(x_ref, m0_ref, m1_ref, m2_ref, m3_ref, m4_ref,
                   w1_ref, b1_ref, w2_ref, b2_ref, w3_ref, b3_ref,
                   w4_ref, b4_ref, w5_ref, b5_ref, out_ref):
    # All num_samples MC passes are folded into the row (M) dimension, so every
    # Linear layer below is a single batched MXU matmul (bf16 in, f32 acc).
    f32 = jnp.float32

    # Dropout_model(dropout_prob) on the (frozen) features.
    h = x_ref[...] * m0_ref[...]

    # fc: Linear(2048,1024) -> ReLU -> Dropout(0.3) -> ... -> Linear(128,num_class)
    h = jnp.dot(h.astype(w1_ref.dtype), w1_ref[...],
                preferred_element_type=f32) + b1_ref[...]
    h = jnp.maximum(h, 0.0) * m1_ref[...]

    h = jnp.dot(h.astype(w2_ref.dtype), w2_ref[...],
                preferred_element_type=f32) + b2_ref[...]
    h = jnp.maximum(h, 0.0) * m2_ref[...]

    h = jnp.dot(h.astype(w3_ref.dtype), w3_ref[...],
                preferred_element_type=f32) + b3_ref[...]
    h = jnp.maximum(h, 0.0) * m3_ref[...]

    h = jnp.dot(h.astype(w4_ref.dtype), w4_ref[...],
                preferred_element_type=f32) + b4_ref[...]
    h = jnp.maximum(h, 0.0) * m4_ref[...]

    out = jnp.dot(h.astype(w5_ref.dtype), w5_ref[...],
                  preferred_element_type=f32) + b5_ref[...]
    out_ref[...] = out                                   # lane-dense (tm, 128) slab


def mc_dropout_head(features, head_params, dropout_masks, *, num_class):
    """features: (M, 2048) with M = B*num_samples rows (batch-major)."""
    M, _ = features.shape
    w1, b1, w2, b2, w3, b3, w4, b4, w5, b5 = head_params
    m0, m1, m2, m3, m4 = dropout_masks

    # Lane-dense output: pad final num_class columns to a multiple of 128.
    ncp = _round_up(max(num_class, 1), 128)
    w5p = jnp.zeros((w5.shape[0], ncp), w5.dtype).at[:, :num_class].set(w5)
    b5p = jnp.zeros((1, ncp), b5.dtype).at[:, :num_class].set(b5)

    # Row (M) tiling: one grid step for small M, 256-row tiles otherwise.
    if M <= 256:
        Mp = _round_up(M, 8)
        tm = Mp
    else:
        Mp = _round_up(M, 256)
        tm = 256

    def pad_rows(a):
        return a if a.shape[0] == Mp else jnp.pad(a, ((0, Mp - a.shape[0]), (0, 0)))

    xp = pad_rows(features)
    m0, m1, m2, m3, m4 = (pad_rows(m) for m in (m0, m1, m2, m3, m4))

    def row_spec(a):
        return pl.BlockSpec((tm, a.shape[1]), lambda i: (i, 0))

    def full_spec(a):
        return pl.BlockSpec(a.shape, lambda i: (0, 0))   # grid-invariant operand

    params = (w1, b1, w2, b2, w3, b3, w4, b4, w5p, b5p)
    out = pl.pallas_call(
        mc_head_kernel,
        grid=(Mp // tm,),
        in_specs=[row_spec(xp), row_spec(m0), row_spec(m1), row_spec(m2),
                  row_spec(m3), row_spec(m4)] + [full_spec(p) for p in params],
        out_specs=pl.BlockSpec((tm, ncp), lambda i: (i, 0)),
        out_shape=jax.ShapeDtypeStruct((Mp, ncp), jnp.float32),
        compiler_params=pltpu.CompilerParams(
            dimension_semantics=("parallel",),
            vmem_limit_bytes=32 << 20,
        ),
    )(xp, m0, m1, m2, m3, m4, *params)
    return out[:M, :num_class]


# --------------------------------- full model ---------------------------------

def make_dropout_masks(key, rows, dropout_prob):
    # TODO(synk): masks are drawn with jax.random outside the kernel because the
    # in-kernel TPU PRNG (pltpu.prng_*) has no CPU/interpret lowering.
    dims = (2048, 1024, 512, 256, 128)
    probs = (dropout_prob, 0.3, 0.3, 0.3, 0.3)
    keys = jax.random.split(key, len(dims))
    masks = []
    for k, d, p in zip(keys, dims, probs):
        keep = jax.random.bernoulli(k, 1.0 - p, (rows, d))
        masks.append(keep.astype(jnp.float32) * (1.0 / (1.0 - p)))   # inverted dropout
    return tuple(masks)


def mc_dropout_model(x_nchw, fe_params, head_params, *, num_samples, num_class,
                     dropout_prob, key):
    B = x_nchw.shape[0]
    features = feature_extractor(x_nchw, *fe_params)                 # (B, 2048)

    # Fold MC samples into the row dimension, batch-major, so the kernel output
    # reshapes directly to (B, num_samples, num_class) (no transpose needed).
    F_dim = features.shape[1]
    feats_rep = jnp.broadcast_to(features[:, None, :], (B, num_samples, F_dim))
    feats_rep = feats_rep.reshape(B * num_samples, F_dim)

    masks = make_dropout_masks(key, B * num_samples, dropout_prob)
    flat = mc_dropout_head(feats_rep, head_params, masks, num_class=num_class)
    h = flat.reshape(B, num_samples, num_class)                      # matches torch view
    outputs_list = [h[:, i, :] for i in range(num_samples)]          # like `List`
    return h, outputs_list


def init_params(key, in_channels, num_class):
    dims = [2048, 1024, 512, 256, 128, num_class]
    keys = jax.random.split(key, len(dims))          # 1 FE + 5 head layers
    w_fe = jax.random.normal(keys[0], (in_channels, 2048), jnp.float32) * 0.02
    b_fe = jnp.zeros((1, 2048), jnp.float32)
    head = []
    for i in range(5):
        fan_in, fan_out = dims[i], dims[i + 1]
        w = (jax.random.normal(keys[i + 1], (fan_in, fan_out), jnp.float32)
             * (1.0 / fan_in) ** 0.5).astype(jnp.bfloat16)   # bf16 weights for MXU
        b = jnp.zeros((1, fan_out), jnp.float32)
        head += [w, b]
    return (w_fe, b_fe), tuple(head)


if __name__ == "__main__":
    B, C, H, W = 2, 4, 16, 16
    num_class, num_samples, dropout_prob = 10, 4, 0.5

    key = jax.random.PRNGKey(0)
    k_x, k_p, k_d = jax.random.split(key, 3)
    x = jax.random.normal(k_x, (B, C, H, W), jnp.float32)
    fe_params, head_params = init_params(k_p, C, num_class)

    h, outputs_list = mc_dropout_model(
        x, fe_params, head_params,
        num_samples=num_samples, num_class=num_class,
        dropout_prob=dropout_prob, key=k_d)

    jax.block_until_ready(h)
    assert h.shape == (B, num_samples, num_class)
    assert len(outputs_list) == num_samples
    assert outputs_list[0].shape == (B, num_class)
    print("KERNEL_OK")
</pallas_src>

<mosaic_0001>
module attributes {stable_mosaic.version = 11 : i64} {
  func.func @fe_kernel(%arg0: i32, %arg1: memref<2x4x256xf32, #tpu.memory_space<vmem>>, %arg2: memref<4x2048xf32, #tpu.memory_space<vmem>>, %arg3: memref<1x2048xf32, #tpu.memory_space<vmem>>, %arg4: memref<2x2048xf32, #tpu.memory_space<vmem>>) attributes {dimension_semantics = [#tpu.dimension_semantics<parallel>], iteration_bounds = array<i64: 1>, scalar_prefetch = 0 : i64, scratch_operands = 0 : i64, tpu.core_type = #tpu.core_type<tc>, window_params = [{transform_indices = @transform_0, window_bounds = array<i64: 2, 4, 256>}, {pipeline_mode = #tpu.pipeline_mode<synchronous>, transform_indices = @transform_1, window_bounds = array<i64: 4, 2048>}, {pipeline_mode = #tpu.pipeline_mode<synchronous>, transform_indices = @transform_2, window_bounds = array<i64: 1, 2048>}, {transform_indices = @transform_3, window_bounds = array<i64: 2, 2048>}]} {
    %c0 = arith.constant 0 : index
    %c0_0 = arith.constant 0 : index
    %c0_1 = arith.constant 0 : index
    %0 = vector.load %arg1[%c0, %c0_0, %c0_1] : memref<2x4x256xf32, #tpu.memory_space<vmem>>, vector<2x4x256xf32>
    %cst = arith.constant dense<0.000000e+00> : vector<2x4xf32>
    %1 = vector.multi_reduction <add>, %0, %cst [2] : vector<2x4x256xf32> to vector<2x4xf32>
    %cst_2 = arith.constant 2.560000e+02 : f32
    %2 = vector.broadcast %cst_2 : f32 to vector<2x4xf32>
    %3 = arith.divf %1, %2 : vector<2x4xf32>
    %c0_3 = arith.constant 0 : index
    %c0_4 = arith.constant 0 : index
    %4 = vector.load %arg2[%c0_3, %c0_4] : memref<4x2048xf32, #tpu.memory_space<vmem>>, vector<4x2048xf32>
    %cst_5 = arith.constant dense<0.000000e+00> : vector<2x2048xf32>
    %5 = tpu.matmul %3, %4, %cst_5 {dimension_numbers = #tpu.dot_dimension_numbers<[1], [0], [0], [1], [0, 0, 1, 1], [], []>} : vector<2x4xf32>, vector<4x2048xf32>, vector<2x2048xf32> -> vector<2x2048xf32>
    %c0_6 = arith.constant 0 : index
    %c0_7 = arith.constant 0 : index
    %6 = vector.load %arg3[%c0_6, %c0_7] : memref<1x2048xf32, #tpu.memory_space<vmem>>, vector<1x2048xf32>
    %7 = vector.broadcast %6 : vector<1x2048xf32> to vector<2x2048xf32>
    %8 = arith.addf %5, %7 : vector<2x2048xf32>
    %cst_8 = arith.constant 0.000000e+00 : f32
    %9 = vector.broadcast %cst_8 : f32 to vector<2x2048xf32>
    %10 = arith.maximumf %8, %9 : vector<2x2048xf32>
    %c0_9 = arith.constant 0 : index
    %c0_10 = arith.constant 0 : index
    %11 = vector.load %arg4[%c0_9, %c0_10] : memref<2x2048xf32, #tpu.memory_space<vmem>>, vector<2x2048xf32>
    tpu.vector_store %arg4[%c0_9, %c0_10], %10 {strides = array<i32>} : memref<2x2048xf32, #tpu.memory_space<vmem>>, vector<2x2048xf32>,
    return
  }
  func.func @transform_0(%arg0: i32) -> (i32, i32, i32) {
    %c0_i32 = arith.constant 0 : i32
    %c0_i32_0 = arith.constant 0 : i32
    %c0_i32_1 = arith.constant 0 : i32
    return %arg0, %c0_i32, %c0_i32_0 : i32, i32, i32
  }
  func.func @transform_1(%arg0: i32) -> (i32, i32) {
    %c0_i32 = arith.constant 0 : i32
    %c0_i32_0 = arith.constant 0 : i32
    %c0_i32_1 = arith.constant 0 : i32
    return %c0_i32, %c0_i32_0 : i32, i32
  }
  func.func @transform_2(%arg0: i32) -> (i32, i32) {
    %c0_i32 = arith.constant 0 : i32
    %c0_i32_0 = arith.constant 0 : i32
    %c0_i32_1 = arith.constant 0 : i32
    return %c0_i32, %c0_i32_0 : i32, i32
  }
  func.func @transform_3(%arg0: i32) -> (i32, i32) {
    %c0_i32 = arith.constant 0 : i32
    %c0_i32_0 = arith.constant 0 : i32
    return %arg0, %c0_i32 : i32, i32
  }
}

</mosaic_0001>

<bundles_post_ra>
// kernel: tpu_custom_call.1
= control target key start
LH: loop header
LB: loop body
LE: loop exit
PB: predicated region body
PF: predicated region fallthrough
CT: control target
= control target key end

     0   :  { %8 = vsyncpa [#allocation3], 0  ;;  %s1192_s0 = inlined_call_operand.hbm [shape: f32[2,4,256], index: 0, kind: input, shape index: {}]   ;;  %s1193_s1 = inlined_call_operand.hbm [shape: f32[4,2048], index: 1, kind: input, shape index: {}]   ;;  %s1194_s2 = inlined_call_operand.hbm [shape: f32[1,2048], index: 2, kind: input, shape index: {}]   ;;  %s1195_s3 = inlined_call_operand.hbm [shape: f32[2,2048], index: 3, kind: output, shape index: {}]  }
   0x1   :  { %9 = vsyncpa [#allocation6], 0 }
   0x2   :  { %10 = vsyncpa [#allocation4], 0  ;;  %s1059_s12 = smov [#allocation5]   ;;  %s1060_s14 = smov [#allocation2]  }
   0x3   :  { %s29_s13 = sshll.u32 %s1059_s12, 4  ;;  %s16_s15 = sshll.u32 %s1060_s14, 4  ;;  %s30_s13 = int_to_ptr.vmem [resolvable:$true] %s29_s13  ;;  %s1087_s15 = int_to_ptr.vmem [resolvable:$true] %s16_s15 }
   0x4   :  { %s965_s18 = scalar_lea.hbm %s1193_s1, 1024 }
   0x5   :  { %p966_p0 = scmp.ne.s32.totalorder %s1193_s1, %s965_s18  ;;  %p969_p1 = scmp.lt.u32.totalorder %s965_s18, %s1193_s1 }
   0x7   :  { %p971_p2 = pnand %p969_p1, %p966_p0 }
   0x9   :  { %974 = shalt.err (!%p971_p2)
}
   0xa   :  { %s975_s23 = scalar_lea.vmem %s30_s13, 1024  ;;  %p980_p4 = scmp.lt.s32.totalorder %s30_s13, %s30_s13 }
   0xb   :  { %p976_p3 = scmp.ne.s32.totalorder %s30_s13, %s975_s23  ;;  %p981_p5 = scmp.lt.s32.totalorder %s975_s23, %s975_s23 }
   0xd   :  { %p982_p6 = por %p981_p5, %p980_p4 }
   0xf   :  { %p983_p7 = pnand %p982_p6, %p976_p3 }
  0x11   :  { %986 = shalt.err (!%p983_p7)
}
  0x12   :  { %32 = dma.hbm_to_vmem [thread:$0]  %s1193_s1, 1024, %s30_s13, [#allocation6]  }
  0x13   :  { %s987_s28 = scalar_lea.hbm %s1192_s0, 256 }
  0x14   :  { %p988_p8 = scmp.ne.s32.totalorder %s1192_s0, %s987_s28  ;;  %p991_p9 = scmp.lt.u32.totalorder %s987_s28, %s1192_s0 }
  0x16   :  { %p993_p10 = pnand %p991_p9, %p988_p8 }
  0x18   :  { %996 = shalt.err (!%p993_p10)
}
  0x19   :  { %s997_s6 = scalar_lea.vmem %s1087_s15, 256  ;;  %p1002_p12 = scmp.lt.s32.totalorder %s1087_s15, %s1087_s15 }
  0x1a   :  { %p998_p11 = scmp.ne.s32.totalorder %s1087_s15, %s997_s6  ;;  %p1003_p13 = scmp.lt.s32.totalorder %s997_s6, %s997_s6 }
  0x1c   :  { %p1004_p0 = por %p1003_p13, %p1002_p12 }
  0x1e   :  { %p1005_p1 = pnand %p1004_p0, %p998_p11 }
  0x20   :  { %1008 = shalt.err (!%p1005_p1)
}
  0x21   :  { %s1061_s1 = smov 128   ;;  %s1062_s7 = smov 8  }
  0x22   :  { %22 = dma.hbm_to_vmem [thread:$0]  %s1192_s0, 256, %s1087_s15, [#allocation3], %s1061_s1, %s1061_s1, %s1062_s7  }
  0x23   :  { %s1063_s10 = smov [#allocation7]   ;;  %s1009_s14 = scalar_lea.hbm %s1194_s2, 256 }
  0x24   :  { %s39_s11 = sshll.u32 %s1063_s10, 4  ;;  %p1010_p2 = scmp.ne.s32.totalorder %s1194_s2, %s1009_s14  ;;  %s40_s11 = int_to_ptr.vmem [resolvable:$true] %s39_s11 }
  0x25   :  { %p1013_p3 = scmp.lt.u32.totalorder %s1009_s14, %s1194_s2 }
  0x27   :  { %p1015_p4 = pnand %p1013_p3, %p1010_p2 }
  0x29   :  { %1018 = shalt.err (!%p1015_p4)
}
  0x2a   :  { %s1019_s20 = scalar_lea.vmem %s40_s11, 256  ;;  %p1024_p6 = scmp.lt.s32.totalorder %s40_s11, %s40_s11 }
  0x2b   :  { %p1020_p5 = scmp.ne.s32.totalorder %s40_s11, %s1019_s20  ;;  %p1025_p7 = scmp.lt.s32.totalorder %s1019_s20, %s1019_s20 }
  0x2d   :  { %p1026_p8 = por %p1025_p7, %p1024_p6 }
  0x2f   :  { %p1027_p9 = pnand %p1026_p8, %p1020_p5 }
  0x31   :  { %1030 = shalt.err (!%p1027_p9)
}
  0x32   :  { %42 = dma.hbm_to_vmem [thread:$0]  %s1194_s2, 256, %s40_s11, [#allocation6]  }
  0x33   :  { %1053 = dma.done.wait [#allocation3], 256  }
  0x34   :  { %1054 = vsyncadd [#allocation3], 4294967040 }
  0x35   :  { %1055 = dma.done.wait [#allocation6], 1280  }
  0x36   :  { %1056 = vsyncadd [#allocation6], 4294966016  ;;  %vm60_vm0 = vcmask 1043456   ;;  %v52_v0 = vld [vmem:[#allocation2] sm:$0xff]  ;;  %v53_v1 = vld [vmem:[#allocation2 + $0x8] sm:$0xff]  ;;  %v1064_v16 = vmov 0.0   ;;  %v86_v19 = vlaneseq }
  0x37   :  { %v56_v2 = vcombine.high %v52_v0, %v52_v0  ;;  %v61_v3 = vsel %vm60_vm0, %v52_v0, 0.0  ;;  %v57_v4 = vcombine.high %v53_v1, %v53_v1  ;;  %v66_v6 = vsel %vm60_vm0, %v53_v1, 0.0  ;;  %v74_v10 = vld [vmem:[#allocation5] sm:$0xff]  ;;  %v75_v11 = vld [vmem:[#allocation5 + $0x8] sm:$0xff]  ;;  %v76_v14 = vld [vmem:[#allocation5 + $0x10] sm:$0xff]  ;;  %295 = vmatprep.mubr.f32.mxu0 %v1064_v16  ;;  %366 = vmatprep.mubr.f32.mxu1 %v1064_v16  ;;  %s1066_s2 = smov [#allocation8]  }
  0x38   :  { %v188_v12 = vcombine.high %v74_v10, %v74_v10  ;;  %v189_v13 = vcombine.high %v75_v11, %v75_v11  ;;  %v77_v15 = vld [vmem:[#allocation5 + $0x18] sm:$0xff]  ;;  %v190_v17 = vcombine.high %v76_v14, %v76_v14  ;;  %v1140_v20 = vshrl.u32 %v86_v19, 7  ;;  %v78_v27 = vld [vmem:[#allocation5 + $0x20] sm:$0xff]  ;;  %v79_v28 = vld [vmem:[#allocation5 + $0x28] sm:$0xff]  ;;  %s913_s21 = sshll.u32 %s1066_s2, 4  ;;  %s914_s21 = int_to_ptr.vmem [resolvable:$true] %s913_s21 }
  0x39   :  { %v62_v5 = vsel %vm60_vm0, %v56_v2, 0.0  ;;  %v67_v7 = vsel %vm60_vm0, %v57_v4, 0.0  ;;  %v191_v18 = vcombine.high %v77_v15, %v77_v15  ;;  %v169_v21 = vand.u32 127, %v86_v19  ;;  %v80_v34 = vld [vmem:[#allocation5 + $0x30] sm:$0xff]  ;;  %v81_v35 = vld [vmem:[#allocation5 + $0x38] sm:$0xff]  ;;  %v82_v40 = vld [vmem:[#allocation7] sm:$0xff]  ;;  %p1036_p11 = scmp.lt.s32.totalorder %s914_s21, %s914_s21 }
  0x3a   :  { %v63_v8 = vadd.f32 %v62_v5, %v61_v3  ;;  %v68_v9 = vadd.f32 %v67_v7, %v66_v6  ;;  %923 = vmatprep.subr.msk.mxu0 %vm60_vm0, %v188_v12  ;;  %926 = vmatprep.subr.msk.mxu1 %vm60_vm0, %v189_v13  ;;  %vm178_vm1 = vcmask 1041409   ;;  %vm196_vm2 = vcmask 31744   ;;  %v83_v62 = vld [vmem:[#allocation7 + $0x8] sm:$0xff]  ;;  %s1031_s22 = scalar_lea.vmem %s914_s21, 512 }
  0x3b   :  { %924 = vmatpush1.msk.msra.mxu0 %vm60_vm0, %v74_v10  ;;  %927 = vmatpush1.msk.msra.mxu1 %vm60_vm0, %v75_v11  ;;  %v172_v23 = vsub.s32 %v169_v21, %v1140_v20  ;;  %v192_v32 = vcombine.high %v78_v27, %v78_v27  ;;  %v193_v33 = vcombine.high %v79_v28, %v79_v28  ;;  %v88_v38 = vsub.s32 0, %v1140_v20  ;;  %p1032_p10 = scmp.ne.s32.totalorder %s914_s21, %s1031_s22  ;;  %p1037_p12 = scmp.lt.s32.totalorder %s1031_s22, %s1031_s22 }
  0x3c   :  { %64 = vadd.xlane.f32.xlu0 %v63_v8  ;;  %929 = vmatprep.subr.msk.mxu0 %vm60_vm0, %v190_v17  ;;  %v194_v36 = vcombine.high %v80_v34, %v80_v34  ;;  %v195_v37 = vcombine.high %v81_v35, %v81_v35  ;;  %v96_v39 = vsub.s32 2, %v1140_v20  ;;  %v92_v41 = vsub.s32 1, %v1140_v20 }
  0x3d   :  { %932 = vmatprep.subr.msk.mxu1 %vm60_vm0, %v191_v18  ;;  %v100_v42 = vsub.s32 3, %v1140_v20  ;;  %v1065_v43 = vmov 1983009808   ;;  %v89_v45 = vrot.slane %v82_v40, %v88_v38  ;;  %v104_v47 = vsub.s32 4, %v1140_v20  ;;  %p1038_p13 = por %p1037_p12, %p1036_p11 }
  0x3e   :  { %v834_v44 = vunpack.c.l.s4 %v1065_v43  ;;  %v97_v46 = vrot.slane %v82_v40, %v96_v39  ;;  %v112_v48 = vsub.s32 6, %v1140_v20  ;;  %v93_v49 = vrot.slane %v82_v40, %v92_v41 }
  0x3f   :  { %v101_v50 = vrot.slane %v82_v40, %v100_v42  ;;  %v108_v51 = vsub.s32 5, %v1140_v20  ;;  %v116_v52 = vsub.s32 7, %v1140_v20  ;;  %v105_v60 = vrot.slane %v82_v40, %v104_v47  ;;  %p1039_p0 = pnand %p1038_p13, %p1032_p10 }
  0x40   :  { %69 = vadd.xlane.f32.xlu0 %v68_v9  ;;  %v835_v53 = vunpack.c.0.s8 %v834_v44  ;;  %v113_v61 = vrot.slane %v82_v40, %v112_v48  ;;  %v121_v10 = vrot.slane %v83_v62, %v88_v38  ;;  %v129_v11 = vrot.slane %v83_v62, %v96_v39 }
  0x41   :  { %v109_v1 = vrot.slane %v82_v40, %v108_v51  ;;  %v117_v2 = vrot.slane %v82_v40, %v116_v52  ;;  %v133_v17 = vrot.slane %v83_v62, %v100_v42 }
  0x42   :  { %v1170_v5 = vsub.s32 %v835_v53, %v1140_v20  ;;  %v137_v20 = vrot.slane %v83_v62, %v104_v47 }
  0xc9   :  { %v65_v22 = vpop.xlane.xlu0 %64 }
  0xca   :  { %v72_v24 = vmul.f32 0.00390625, %v65_v22 }
  0xcc   :  { %v173_v29 = vrot.slane %v72_v24, %v172_v23 }
  0xcd   :  { %v70_v25 = vpop.xlane.xlu0 %69 }
  0xce   :  { %v73_v26 = vmul.f32 0.00390625, %v70_v25  ;;  %v145_v25 = vrot.slane %v83_v62, %v112_v48 }
  0xd0   :  { %v177_v30 = vrot.slane %v73_v26, %v172_v23 }
  0xd2   :  { %v179_v31 = vsel %vm178_vm1, %v177_v30, %v173_v29 }
  0xd3   :  { %925 = vmatmul.mubr.msk.f32.vlgmr.msra.gmra.mrb[0].mxu0 %vm196_vm2, %v179_v31  ;;  %928 = vmatmul.mubr.msk.f32.vlgmr.msra.gmra.mrb[0].mxu1 %vm196_vm2, %v179_v31 }
  0xd4   :  { %930 = vmatpush1.msk.msra.mxu0 %vm60_vm0, %v76_v14  ;;  %933 = vmatpush1.msk.msra.mxu1 %vm60_vm0, %v77_v15 }
  0xd5   :  { %437 = vmatprep.mubr.f32.mxu0 %v1064_v16  ;;  %508 = vmatprep.mubr.f32.mxu1 %v1064_v16 }
  0xd6   :  { %935 = vmatprep.subr.msk.mxu0 %vm60_vm0, %v192_v32  ;;  %938 = vmatprep.subr.msk.mxu1 %vm60_vm0, %v193_v33 }
  0xd7   :  { %931 = vmatmul.mubr.msk.f32.vlgmr.msra.gmra.mrb[2].mxu0 %vm196_vm2, %v179_v31  ;;  %934 = vmatmul.mubr.msk.f32.vlgmr.msra.gmra.mrb[2].mxu1 %vm196_vm2, %v179_v31 }
  0xd8   :  { %936 = vmatpush1.msk.msra.mxu0 %vm60_vm0, %v78_v27  ;;  %939 = vmatpush1.msk.msra.mxu1 %vm60_vm0, %v79_v28 }
  0xd9   :  { %579 = vmatprep.mubr.f32.mxu0 %v1064_v16  ;;  %650 = vmatprep.mubr.f32.mxu1 %v1064_v16 }
  0xda   :  { %941 = vmatprep.subr.msk.mxu0 %vm60_vm0, %v194_v36  ;;  %944 = vmatprep.subr.msk.mxu1 %vm60_vm0, %v195_v37  ;;  %v141_v36 = vrot.slane %v83_v62, %v108_v51  ;;  %v149_v37 = vrot.slane %v83_v62, %v116_v52 }
  0xdb   :  { %937 = vmatmul.mubr.msk.f32.vlgmr.msra.gmra.mrb[4].mxu0 %vm196_vm2, %v179_v31  ;;  %940 = vmatmul.mubr.msk.f32.vlgmr.msra.gmra.mrb[4].mxu1 %vm196_vm2, %v179_v31 }
  0xdc   :  { %942 = vmatpush1.msk.msra.mxu0 %vm60_vm0, %v80_v34  ;;  %945 = vmatpush1.msk.msra.mxu1 %vm60_vm0, %v81_v35 }
  0xdd   :  { %721 = vmatprep.mubr.f32.mxu0 %v1064_v16  ;;  %792 = vmatprep.mubr.f32.mxu1 %v1064_v16  ;;  %v125_v16 = vrot.slane %v83_v62, %v92_v41 }
  0xdf   :  { %943 = vmatmul.mubr.msk.f32.vlgmr.msra.gmra.mrb[6].mxu0 %vm196_vm2, %v179_v31  ;;  %946 = vmatmul.mubr.msk.f32.vlgmr.msra.gmra.mrb[6].mxu1 %vm196_vm2, %v179_v31 }
 0x1a6   :  { %v297_v54 = vpop.f32.mrb[0].mxu0  ;;  %v368_v55 = vpop.f32.mrb[0].mxu1 }
 0x1a7   :  { %v298_v56 = vadd.f32 %v297_v54, %v89_v45  ;;  %v369_v57 = vadd.f32 %v368_v55, %v97_v46  ;;  %v299_v58 = vpop.f32.mrb[1].mxu0  ;;  %v370_v59 = vpop.f32.mrb[1].mxu1 }
 0x1a8   :  { %v300_v63 = vadd.f32 %v299_v58, %v93_v49  ;;  %v371_v0 = vadd.f32 %v370_v59, %v101_v50 }
 0x1a9   :  { %v799_v3 = vmax.f32 %v298_v56, 0.0  ;;  %v801_v4 = vmax.f32 %v369_v57, 0.0 }
 0x1aa   :  { %v800_v6 = vmax.f32 %v300_v63, 0.0  ;;  %v802_v7 = vmax.f32 %v371_v0, 0.0  ;;  %v439_v8 = vpop.f32.mrb[2].mxu0  ;;  %v510_v9 = vpop.f32.mrb[2].mxu1 }
 0x1ab   :  { %v440_v12 = vadd.f32 %v439_v8, %v105_v60  ;;  %v511_v13 = vadd.f32 %v510_v9, %v113_v61  ;;  %v441_v14 = vpop.f32.mrb[3].mxu0  ;;  %v512_v15 = vpop.f32.mrb[3].mxu1 }
 0x1ac   :  { %v831_v18 = vcombine.low %v799_v3, %v800_v6  ;;  %v832_v19 = vcombine.low %v801_v4, %v802_v7  ;;  %v442_v21 = vadd.f32 %v441_v14, %v109_v1  ;;  %v513_v22 = vadd.f32 %v512_v15, %v117_v2 }
 0x1ad   :  { %v803_v23 = vmax.f32 %v440_v12, 0.0  ;;  %v805_v24 = vmax.f32 %v511_v13, 0.0 }
 0x1ae   :  { %v839_v26 = vrot.slane %v831_v18, %v1170_v5  ;;  %v846_v27 = vrot.slane %v832_v19, %v1170_v5  ;;  %v804_v28 = vmax.f32 %v442_v21, 0.0  ;;  %v806_v29 = vmax.f32 %v513_v22, 0.0  ;;  %v581_v30 = vpop.f32.mrb[4].mxu0  ;;  %v652_v31 = vpop.f32.mrb[4].mxu1 }
 0x1af   :  { %v582_v32 = vadd.f32 %v581_v30, %v121_v10  ;;  %v653_v33 = vadd.f32 %v652_v31, %v129_v11  ;;  %v583_v34 = vpop.f32.mrb[5].mxu0  ;;  %v654_v35 = vpop.f32.mrb[5].mxu1 }
 0x1b0   :  { %v847_v38 = vcombine.low %v839_v26, %v846_v27  ;;  %v848_v39 = vcombine.low %v803_v23, %v804_v28  ;;  %v849_v40 = vcombine.low %v805_v24, %v806_v29  ;;  %v584_v41 = vadd.f32 %v583_v34, %v125_v16 }
 0x1b1   :  { %v807_v42 = vmax.f32 %v582_v32, 0.0  ;;  %v809_v43 = vmax.f32 %v653_v33, 0.0  ;;  %v655_v44 = vadd.f32 %v654_v35, %v133_v17 }
 0x1b2   :  { %903 = vst [vmem:[#allocation8] sm:$0xff] %v847_v38  ;;  %v856_v45 = vrot.slane %v848_v39, %v1170_v5  ;;  %v863_v46 = vrot.slane %v849_v40, %v1170_v5  ;;  %v808_v47 = vmax.f32 %v584_v41, 0.0  ;;  %v723_v48 = vpop.f32.mrb[6].mxu0  ;;  %v794_v49 = vpop.f32.mrb[6].mxu1 }
 0x1b3   :  { %v810_v50 = vmax.f32 %v655_v44, 0.0  ;;  %v724_v53 = vadd.f32 %v723_v48, %v137_v20  ;;  %v795_v54 = vadd.f32 %v794_v49, %v145_v25  ;;  %v725_v51 = vpop.f32.mrb[7].mxu0  ;;  %v796_v52 = vpop.f32.mrb[7].mxu1 }
 0x1b4   :  { %v864_v55 = vcombine.low %v856_v45, %v863_v46  ;;  %v865_v56 = vcombine.low %v807_v42, %v808_v47  ;;  %v726_v57 = vadd.f32 %v725_v51, %v141_v36  ;;  %v797_v58 = vadd.f32 %v796_v52, %v149_v37 }
 0x1b5   :  { %v866_v59 = vcombine.low %v809_v43, %v810_v50  ;;  %v811_v60 = vmax.f32 %v724_v53, 0.0  ;;  %v813_v61 = vmax.f32 %v795_v54, 0.0 }
 0x1b6   :  { %904 = vst [vmem:[#allocation8 + $0x8] sm:$0xff] %v864_v55  ;;  %v873_v62 = vrot.slane %v865_v56, %v1170_v5  ;;  %v812_v63 = vmax.f32 %v726_v57, 0.0  ;;  %v814_v0 = vmax.f32 %v797_v58, 0.0 }
 0x1b7   :  { %v880_v1 = vrot.slane %v866_v59, %v1170_v5 }
 0x1b8   :  { %v882_v2 = vcombine.low %v811_v60, %v812_v63  ;;  %v883_v3 = vcombine.low %v813_v61, %v814_v0 }
 0x1b9   :  { %v881_v4 = vcombine.low %v873_v62, %v880_v1 }
 0x1ba   :  { %v890_v6 = vrot.slane %v882_v2, %v1170_v5  ;;  %v897_v7 = vrot.slane %v883_v3, %v1170_v5 }
 0x1bb   :  { %905 = vst [vmem:[#allocation8 + $0x10] sm:$0xff] %v881_v4 }
 0x1bc   :  { %v898_v8 = vcombine.low %v890_v6, %v897_v7 }
 0x1be   :  { %906 = vst [vmem:[#allocation8 + $0x18] sm:$0xff] %v898_v8 }
 0x1bf   :  { %1042 = shalt.err (!%p1039_p0)
}
 0x1c0   :  { %s1043_s25 = scalar_lea.hbm %s1195_s3, 512 }
 0x1c1   :  { %p1044_p1 = scmp.ne.s32.totalorder %s1195_s3, %s1043_s25  ;;  %p1047_p2 = scmp.lt.u32.totalorder %s1043_s25, %s1195_s3 }
 0x1c3   :  { %p1049_p3 = pnand %p1047_p2, %p1044_p1 }
 0x1c5   :  { %1052 = shalt.err (!%p1049_p3)
}
 0x1c6   :  { %916 = dma.vmem_to_hbm [thread:$0]  %s914_s21, 512, %s1195_s3, [#allocation4]  }
 0x1c7   :  { %1057 = dma.done.wait [#allocation4], 512  }
 0x1c8   :  { %1058 = vsyncadd [#allocation4], 4294966784 }
 0x1c9   :  { %920 = vsyncpa [#allocation3], 1 }
 0x1ca   :  { %921 = vsyncpa [#allocation6], 1 }
 0x1cb   :  { %922 = vsyncpa [#allocation4], 1 }

</bundles_post_ra>
